<compile_context>
chip_gen: v7x
topology: tpu7x:2x2x1
jax: 0.10.0
libtpu: 0.0.40
codegen_flags: <defaults>
</compile_context>

<pallas_src>
import jax
import jax.numpy as jnp
from jax.experimental import pallas as pl
from jax.experimental.pallas import tpu as pltpu

LANE = 128
_NEG_PAD = -1e30  # padded Q lanes can never win an argmax


def _round_up(n, m):
    return ((n + m - 1) // m) * m


def qnet_kernel(x_ref, w1_ref, b1_ref, w2_ref, b2_ref, w3_ref, b3_ref, o_ref):
    # x is f32 in HBM/VMEM; cast to bf16 only for the MXU operand.
    x_bf = x_ref[...].astype(jnp.bfloat16)
    h1 = jnp.dot(x_bf, w1_ref[...],
                 preferred_element_type=jnp.float32) + b1_ref[...]
    h1 = jnp.maximum(h1, 0.0)
    h2 = jnp.dot(h1.astype(jnp.bfloat16), w2_ref[...],
                 preferred_element_type=jnp.float32) + b2_ref[...]
    h2 = jnp.maximum(h2, 0.0)
    q = jnp.dot(h2.astype(jnp.bfloat16), w3_ref[...],
                preferred_element_type=jnp.float32) + b3_ref[...]
    o_ref[...] = q.astype(o_ref.dtype)


def prepare_params(params):
    """One-time parameter prep (hoisted out of the per-step forward call):
    bf16 weight casts + lane-padding of the last layer to a multiple of 128.
    Padded bias lanes are -1e30 so argmax over a padded output is safe."""
    w1, b1, w2, b2, w3, b3 = params
    S, H1 = w1.shape
    H2, A = w3.shape
    A_pad = _round_up(A, LANE)

    w3p = jnp.zeros((H2, A_pad), jnp.float32).at[:, :A].set(w3)
    b3p = jnp.full((1, A_pad), _NEG_PAD, jnp.float32).at[:, :A].set(
        jnp.asarray(b3).reshape(1, -1))

    return {
        "w1": w1.astype(jnp.bfloat16),
        "b1": jnp.asarray(b1).reshape(1, -1).astype(jnp.float32),
        "w2": w2.astype(jnp.bfloat16),
        "b2": jnp.asarray(b2).reshape(1, -1).astype(jnp.float32),
        "w3": w3p.astype(jnp.bfloat16),
        "b3": b3p,
        "state_size": S, "h1": H1, "h2": H2,
        "action_size": A, "a_pad": A_pad,
    }


def qnetwork_forward(x, prep, *, block_b=1024, out_dtype=jnp.bfloat16,
                     slice_output=True):
    """x: (B, state_size) f32. prep: dict from prepare_params().

    slice_output=True  -> (B, action_size) in out_dtype (module-compatible).
    slice_output=False -> padded (B_pad, A_pad); padded rows are garbage-free
                          zeros-of-x propagated through the net and padded
                          columns are ~-1e30, so argmax stays correct.
    """
    B, S = x.shape
    assert S == prep["state_size"]
    H1, H2 = prep["h1"], prep["h2"]
    A, A_pad = prep["action_size"], prep["a_pad"]

    # --- batch tiling: multiple of 16 sublanes, capped to stay inside the
    # default scoped-VMEM budget on every TPU generation. -------------------
    tb = min(block_b, _round_up(B, 16))
    if tb >= _round_up(B, 16) and B >= 32:
        # whole batch would be one grid step -> split into ~2 tiles so the
        # "parallel" axis can shard across both TensorCores on v7x.
        tb = _round_up(-(-B // 2), 16)
    tb = max(16, min(_round_up(tb, 16), 4096))

    B_pad = _round_up(B, tb)
    xw = x if B_pad == B else jnp.pad(x, ((0, B_pad - B), (0, 0)))
    grid = (B_pad // tb,)

    def const_spec(shape):
        # Same block every grid step -> DMA'd once, VMEM-resident.
        return pl.BlockSpec(shape, lambda i: (0, 0))

    flops = 2 * B_pad * (S * H1 + H1 * H2 + H2 * A_pad)
    bytes_accessed = (
        B_pad * S * 4                                   # x (f32 read)
        + (prep["w1"].size + prep["w2"].size + prep["w3"].size) * 2
        + (prep["b1"].size + prep["b2"].size + prep["b3"].size) * 4
        + B_pad * A_pad * jnp.dtype(out_dtype).itemsize  # output write
    )

    out = pl.pallas_call(
        qnet_kernel,
        out_shape=jax.ShapeDtypeStruct((B_pad, A_pad), out_dtype),
        grid=grid,
        in_specs=[
            pl.BlockSpec((tb, S), lambda i: (i, 0)),     # streamed x tile
            const_spec((S, H1)), const_spec((1, H1)),
            const_spec((H1, H2)), const_spec((1, H2)),
            const_spec((H2, A_pad)), const_spec((1, A_pad)),
        ],
        out_specs=pl.BlockSpec((tb, A_pad), lambda i: (i, 0)),
        compiler_params=pltpu.CompilerParams(
            dimension_semantics=("parallel",)),
        cost_estimate=pl.CostEstimate(
            flops=flops, transcendentals=0, bytes_accessed=bytes_accessed),
    )(xw, prep["w1"], prep["b1"], prep["w2"], prep["b2"],
      prep["w3"], prep["b3"])

    if slice_output:
        return out[:B, :A]
    return out


def init_qnetwork_params(key, state_size, action_size):
    """Mimics PyTorch nn.Linear default init: U(-1/sqrt(fan_in), 1/sqrt(fan_in)).
    Weights stored as (in_features, out_features) so the kernel computes x@W+b."""
    def linear(key, fan_in, fan_out):
        kw, kb = jax.random.split(key)
        bound = 1.0 / jnp.sqrt(float(fan_in))
        w = jax.random.uniform(kw, (fan_in, fan_out), jnp.float32, -bound, bound)
        b = jax.random.uniform(kb, (1, fan_out), jnp.float32, -bound, bound)
        return w, b

    k1, k2, k3 = jax.random.split(key, 3)
    w1, b1 = linear(k1, state_size, 128)
    w2, b2 = linear(k2, 128, 64)
    w3, b3 = linear(k3, 64, action_size)
    return (w1, b1, w2, b2, w3, b3)


def qnetwork_reference_f32(x, params):
    w1, b1, w2, b2, w3, b3 = params
    h1 = jnp.maximum(x @ w1 + b1, 0.0)
    h2 = jnp.maximum(h1 @ w2 + b2, 0.0)
    return h2 @ w3 + b3


if __name__ == "__main__":
    state_size = 16
    action_size = 4
    batch = 8   # small demo batch; the tiling/pipelining pays off at batch >= 512

    key = jax.random.PRNGKey(0)
    kx, kp = jax.random.split(key)
    x = jax.random.normal(kx, (batch, state_size), jnp.float32)
    params = init_qnetwork_params(kp, state_size, action_size)
    prep = prepare_params(params)   # one-time: casts + lane padding

    # Module-compatible path: (B, A) Q-values.
    out = jax.block_until_ready(qnetwork_forward(x, prep))
    assert out.shape == (batch, action_size), out.shape

    ref = qnetwork_reference_f32(x, params)
    assert jnp.allclose(out.astype(jnp.float32), ref, atol=5e-2, rtol=5e-2), \
        "mismatch vs f32 reference beyond expected bf16 error"

    # Fast path: padded output, no post-kernel slice. Padded lanes must be
    # hugely negative so a downstream argmax can never pick them.
    out_pad = jax.block_until_ready(
        qnetwork_forward(x, prep, slice_output=False))
    assert out_pad.shape[1] == prep["a_pad"], out_pad.shape
    assert bool(jnp.all(out_pad[:batch, action_size:].astype(jnp.float32) < -1e20))
    assert bool(jnp.all(jnp.argmax(out_pad[:batch], axis=-1) < action_size))

    print("KERNEL_OK")
</pallas_src>

<mosaic_0001>
module attributes {stable_mosaic.version = 11 : i64} {
  func.func @qnet_kernel(%arg0: i32, %arg1: memref<16x16xf32, #tpu.memory_space<vmem>>, %arg2: memref<16x128xbf16, #tpu.memory_space<vmem>>, %arg3: memref<1x128xf32, #tpu.memory_space<vmem>>, %arg4: memref<128x64xbf16, #tpu.memory_space<vmem>>, %arg5: memref<1x64xf32, #tpu.memory_space<vmem>>, %arg6: memref<64x128xbf16, #tpu.memory_space<vmem>>, %arg7: memref<1x128xf32, #tpu.memory_space<vmem>>, %arg8: memref<16x128xbf16, #tpu.memory_space<vmem>>) attributes {dimension_semantics = [#tpu.dimension_semantics<parallel>], iteration_bounds = array<i64: 1>, scalar_prefetch = 0 : i64, scratch_operands = 0 : i64, tpu.core_type = #tpu.core_type<tc>, window_params = [{transform_indices = @transform_0, window_bounds = array<i64: 16, 16>}, {pipeline_mode = #tpu.pipeline_mode<synchronous>, transform_indices = @transform_1, window_bounds = array<i64: 16, 128>}, {pipeline_mode = #tpu.pipeline_mode<synchronous>, transform_indices = @transform_2, window_bounds = array<i64: 1, 128>}, {pipeline_mode = #tpu.pipeline_mode<synchronous>, transform_indices = @transform_3, window_bounds = array<i64: 128, 64>}, {pipeline_mode = #tpu.pipeline_mode<synchronous>, transform_indices = @transform_4, window_bounds = array<i64: 1, 64>}, {pipeline_mode = #tpu.pipeline_mode<synchronous>, transform_indices = @transform_5, window_bounds = array<i64: 64, 128>}, {pipeline_mode = #tpu.pipeline_mode<synchronous>, transform_indices = @transform_6, window_bounds = array<i64: 1, 128>}, {transform_indices = @transform_7, window_bounds = array<i64: 16, 128>}]} {
    %c0 = arith.constant 0 : index
    %c0_0 = arith.constant 0 : index
    %0 = vector.load %arg1[%c0, %c0_0] : memref<16x16xf32, #tpu.memory_space<vmem>>, vector<16x16xf32>
    %1 = arith.truncf %0 : vector<16x16xf32> to vector<16x16xbf16>
    %c0_1 = arith.constant 0 : index
    %c0_2 = arith.constant 0 : index
    %2 = vector.load %arg2[%c0_1, %c0_2] : memref<16x128xbf16, #tpu.memory_space<vmem>>, vector<16x128xbf16>
    %cst = arith.constant dense<0.000000e+00> : vector<16x128xf32>
    %3 = tpu.matmul %1, %2, %cst {dimension_numbers = #tpu.dot_dimension_numbers<[1], [0], [0], [1], [0, 0, 1, 1], [], []>} : vector<16x16xbf16>, vector<16x128xbf16>, vector<16x128xf32> -> vector<16x128xf32>
    %c0_3 = arith.constant 0 : index
    %c0_4 = arith.constant 0 : index
    %4 = vector.load %arg3[%c0_3, %c0_4] : memref<1x128xf32, #tpu.memory_space<vmem>>, vector<1x128xf32>
    %5 = vector.broadcast %4 : vector<1x128xf32> to vector<16x128xf32>
    %6 = arith.addf %3, %5 : vector<16x128xf32>
    %cst_5 = arith.constant 0.000000e+00 : f32
    %7 = vector.broadcast %cst_5 : f32 to vector<16x128xf32>
    %8 = arith.maximumf %6, %7 : vector<16x128xf32>
    %9 = arith.truncf %8 : vector<16x128xf32> to vector<16x128xbf16>
    %c0_6 = arith.constant 0 : index
    %c0_7 = arith.constant 0 : index
    %10 = vector.load %arg4[%c0_6, %c0_7] : memref<128x64xbf16, #tpu.memory_space<vmem>>, vector<128x64xbf16>
    %cst_8 = arith.constant dense<0.000000e+00> : vector<16x64xf32>
    %11 = tpu.matmul %9, %10, %cst_8 {dimension_numbers = #tpu.dot_dimension_numbers<[1], [0], [0], [1], [0, 0, 1, 1], [], []>} : vector<16x128xbf16>, vector<128x64xbf16>, vector<16x64xf32> -> vector<16x64xf32>
    %c0_9 = arith.constant 0 : index
    %c0_10 = arith.constant 0 : index
    %12 = vector.load %arg5[%c0_9, %c0_10] : memref<1x64xf32, #tpu.memory_space<vmem>>, vector<1x64xf32>
    %13 = vector.broadcast %12 : vector<1x64xf32> to vector<16x64xf32>
    %14 = arith.addf %11, %13 : vector<16x64xf32>
    %cst_11 = arith.constant 0.000000e+00 : f32
    %15 = vector.broadcast %cst_11 : f32 to vector<16x64xf32>
    %16 = arith.maximumf %14, %15 : vector<16x64xf32>
    %17 = arith.truncf %16 : vector<16x64xf32> to vector<16x64xbf16>
    %c0_12 = arith.constant 0 : index
    %c0_13 = arith.constant 0 : index
    %18 = vector.load %arg6[%c0_12, %c0_13] : memref<64x128xbf16, #tpu.memory_space<vmem>>, vector<64x128xbf16>
    %cst_14 = arith.constant dense<0.000000e+00> : vector<16x128xf32>
    %19 = tpu.matmul %17, %18, %cst_14 {dimension_numbers = #tpu.dot_dimension_numbers<[1], [0], [0], [1], [0, 0, 1, 1], [], []>} : vector<16x64xbf16>, vector<64x128xbf16>, vector<16x128xf32> -> vector<16x128xf32>
    %c0_15 = arith.constant 0 : index
    %c0_16 = arith.constant 0 : index
    %20 = vector.load %arg7[%c0_15, %c0_16] : memref<1x128xf32, #tpu.memory_space<vmem>>, vector<1x128xf32>
    %21 = vector.broadcast %20 : vector<1x128xf32> to vector<16x128xf32>
    %22 = arith.addf %19, %21 : vector<16x128xf32>
    %23 = arith.truncf %22 : vector<16x128xf32> to vector<16x128xbf16>
    %c0_17 = arith.constant 0 : index
    %c0_18 = arith.constant 0 : index
    %24 = vector.load %arg8[%c0_17, %c0_18] : memref<16x128xbf16, #tpu.memory_space<vmem>>, vector<16x128xbf16>
    tpu.vector_store %arg8[%c0_17, %c0_18], %23 {strides = array<i32>} : memref<16x128xbf16, #tpu.memory_space<vmem>>, vector<16x128xbf16>,
    return
  }
  func.func @transform_0(%arg0: i32) -> (i32, i32) {
    %c0_i32 = arith.constant 0 : i32
    %c0_i32_0 = arith.constant 0 : i32
    return %arg0, %c0_i32 : i32, i32
  }
  func.func @transform_1(%arg0: i32) -> (i32, i32) {
    %c0_i32 = arith.constant 0 : i32
    %c0_i32_0 = arith.constant 0 : i32
    %c0_i32_1 = arith.constant 0 : i32
    return %c0_i32, %c0_i32_0 : i32, i32
  }
  func.func @transform_2(%arg0: i32) -> (i32, i32) {
    %c0_i32 = arith.constant 0 : i32
    %c0_i32_0 = arith.constant 0 : i32
    %c0_i32_1 = arith.constant 0 : i32
    return %c0_i32, %c0_i32_0 : i32, i32
  }
  func.func @transform_3(%arg0: i32) -> (i32, i32) {
    %c0_i32 = arith.constant 0 : i32
    %c0_i32_0 = arith.constant 0 : i32
    %c0_i32_1 = arith.constant 0 : i32
    return %c0_i32, %c0_i32_0 : i32, i32
  }
  func.func @transform_4(%arg0: i32) -> (i32, i32) {
    %c0_i32 = arith.constant 0 : i32
    %c0_i32_0 = arith.constant 0 : i32
    %c0_i32_1 = arith.constant 0 : i32
    return %c0_i32, %c0_i32_0 : i32, i32
  }
  func.func @transform_5(%arg0: i32) -> (i32, i32) {
    %c0_i32 = arith.constant 0 : i32
    %c0_i32_0 = arith.constant 0 : i32
    %c0_i32_1 = arith.constant 0 : i32
    return %c0_i32, %c0_i32_0 : i32, i32
  }
  func.func @transform_6(%arg0: i32) -> (i32, i32) {
    %c0_i32 = arith.constant 0 : i32
    %c0_i32_0 = arith.constant 0 : i32
    %c0_i32_1 = arith.constant 0 : i32
    return %c0_i32, %c0_i32_0 : i32, i32
  }
  func.func @transform_7(%arg0: i32) -> (i32, i32) {
    %c0_i32 = arith.constant 0 : i32
    %c0_i32_0 = arith.constant 0 : i32
    return %arg0, %c0_i32 : i32, i32
  }
}

</mosaic_0001>

<bundles_post_ra>
// kernel: tpu_custom_call.1
= control target key start
LH: loop header
LB: loop body
LE: loop exit
PB: predicated region body
PF: predicated region fallthrough
CT: control target
= control target key end

     0   :  { %v442_v1 = vmov 0.0   ;;  %vm443_vm0 = vmmov 0   ;;  %vm46_vm1 = vcmask 130048   ;;  %s553_s0 = inlined_call_operand.vmem [shape: f32[16,16], index: 0, kind: input, shape index: {}]   ;;  %s554_s1 = inlined_call_operand.vmem [shape: bf16[16,128], index: 1, kind: input, shape index: {}]   ;;  %s555_s2 = inlined_call_operand.vmem [shape: f32[1,128], index: 2, kind: input, shape index: {}]   ;;  %s556_s3 = inlined_call_operand.vmem [shape: bf16[128,64], index: 3, kind: input, shape index: {}]   ;;  %s557_s4 = inlined_call_operand.vmem [shape: f32[1,64], index: 4, kind: input, shape index: {}]   ;;  %s558_s5 = inlined_call_operand.vmem [shape: bf16[64,128], index: 5, kind: input, shape index: {}]   ;;  %s559_s6 = inlined_call_operand.vmem [shape: f32[1,128], index: 6, kind: input, shape index: {}]   ;;  %s560_s7 = inlined_call_operand.hbm [shape: bf16[16,128], index: 7, kind: output, shape index: {}]  }
   0x1   :  { %v405_v0 = vld [vmem:[%s554_s1] sm:$0xff]   ;;  %362 = vmatprep.subr.bf16.mxu0 %v442_v1  ;;  %v29_v3 = vld [vmem:[%s553_s0 + $0x8] sm:$0xff]  ;;  %368 = vmatprep.subr.bf16.mxu1 %v442_v1  ;;  %v408_v7 = vld [vmem:[%s556_s3 + $0x10] sm:$0xff]  }
   0x2   :  { %v28_v2 = vld [vmem:[%s553_s0] sm:$0xff]  ;;  %363 = vmatpush3.bf16.msra.mxu0 %v405_v0  ;;  %364 = vmatprep.mubr.msk.bf16.mxu0 %vm443_vm0, %v442_v1  ;;  %v407_v6 = vld [vmem:[%s556_s3 + $0x8] sm:$0xff]   ;;  %v409_v8 = vld [vmem:[%s556_s3 + $0x18] sm:$0xff]  }
   0x3   :  { %v30_v4 = vpack.c.bf16 %v29_v3, %v28_v2  ;;  %v406_v5 = vld [vmem:[%s556_s3] sm:$0xff]   ;;  %384 = vmatprep.mubr.msk.bf16.mxu1 %vm443_vm0, %v442_v1  ;;  %388 = vmatprep.subr.bf16.mxu0 %v442_v1 }
   0x4   :  { %369 = vmatpush3.bf16.msra.mxu1 %v406_v5 }
   0x5   :  { %365 = vmatmul.mubr.msk.bf16.vlgmr.msra.gmra.mrb[0].mxu0 %vm46_vm1, %v30_v4  ;;  %370 = vmatprep.subr.bf16.mxu1 %v442_v1 }
   0x6   :  { %396 = vmatprep.mubr.msk.bf16.mxu0 %vm443_vm0, %v442_v1 }
   0x8   :  { %371 = vmatpush3.bf16.msra.mxu1 %v407_v6 }
   0x9   :  { %372 = vmatprep.subr.bf16.mxu1 %v442_v1 }
   0xc   :  { %373 = vmatpush3.bf16.msra.mxu1 %v408_v7 }
   0xd   :  { %12 = vsyncpa [#allocation3], 0  ;;  %374 = vmatprep.subr.bf16.mxu1 %v442_v1  ;;  %v410_v9 = vld [vmem:[%s556_s3 + $0x20] sm:$0xff]   ;;  %v411_v10 = vld [vmem:[%s556_s3 + $0x28] sm:$0xff]   ;;  %vm248_vm2 = vcmask 523264  }
   0xe   :  { %v412_v11 = vld [vmem:[%s556_s3 + $0x30] sm:$0xff]   ;;  %v413_v12 = vld [vmem:[%s556_s3 + $0x38] sm:$0xff]   ;;  %v414_v13 = vld [vmem:[%s558_s5] sm:$0xff]  }
   0xf   :  { %389 = vmatpush3.bf16.msra.mxu0 %v414_v13  ;;  %v415_v14 = vld [vmem:[%s558_s5 + $0x8] sm:$0xff]   ;;  %v319_v15 = vld [vmem:[%s555_s2] ss:$0 sm:$0xff]  ;;  %v416_v25 = vld [vmem:[%s558_s5 + $0x10] sm:$0xff]  }
  0x10   :  { %375 = vmatpush3.bf16.msra.mxu1 %v409_v8  ;;  %390 = vmatprep.subr.bf16.mxu0 %v442_v1  ;;  %v417_v26 = vld [vmem:[%s558_s5 + $0x18] sm:$0xff]   ;;  %v322_v27 = vld [vmem:[%s557_s4] ss:$0 sm:$0xff]  ;;  %s444_s5 = smov [#allocation2]  }
  0x11   :  { %376 = vmatprep.subr.bf16.mxu1 %v442_v1  ;;  %v331_v37 = vld [vmem:[%s559_s6] ss:$0 sm:$0xff]  ;;  %s308_s9 = sshll.u32 %s444_s5, 4  ;;  %s309_s9 = int_to_ptr.vmem [resolvable:$true] %s308_s9 }
  0x12   :  { %s418_s4 = scalar_lea.vmem %s309_s9, 128  ;;  %p423_p1 = scmp.lt.s32.totalorder %s309_s9, %s309_s9 }
  0x13   :  { %391 = vmatpush3.bf16.msra.mxu0 %v415_v14  ;;  %p419_p0 = scmp.ne.s32.totalorder %s309_s9, %s418_s4  ;;  %p424_p2 = scmp.lt.s32.totalorder %s418_s4, %s418_s4 }
  0x14   :  { %377 = vmatpush3.bf16.msra.mxu1 %v410_v9  ;;  %392 = vmatprep.subr.bf16.mxu0 %v442_v1 }
  0x15   :  { %378 = vmatprep.subr.bf16.mxu1 %v442_v1  ;;  %p425_p3 = por %p424_p2, %p423_p1 }
  0x17   :  { %393 = vmatpush3.bf16.msra.mxu0 %v416_v25  ;;  %p426_p4 = pnand %p425_p3, %p419_p0 }
  0x18   :  { %379 = vmatpush3.bf16.msra.mxu1 %v411_v10  ;;  %394 = vmatprep.subr.bf16.mxu0 %v442_v1 }
  0x19   :  { %380 = vmatprep.subr.bf16.mxu1 %v442_v1 }
  0x1b   :  { %395 = vmatpush3.bf16.msra.mxu0 %v417_v26 }
  0x1c   :  { %381 = vmatpush3.bf16.msra.mxu1 %v412_v11 }
  0x1d   :  { %382 = vmatprep.subr.bf16.mxu1 %v442_v1 }
  0x20   :  { %383 = vmatpush3.bf16.msra.mxu1 %v413_v12 }
  0xd8   :  { %v84_v16 = vpop.f32.mrb[0].mxu0 }
  0xd9   :  { %v85_v17 = vadd.f32 %v319_v15, %v84_v16  ;;  %v366_v18 = vpop.f32.mrb[1].mxu0 }
  0xda   :  { %v87_v19 = vpop.f32.mrb[2].mxu0 }
  0xdb   :  { %v88_v20 = vadd.f32 %v319_v15, %v87_v19  ;;  %v367_v21 = vpop.f32.mrb[3].mxu0  ;;  %v91_v22 = vmax.f32 %v85_v17, 0.0 }
  0xdd   :  { %v92_v23 = vmax.f32 %v88_v20, 0.0 }
  0xdf   :  { %v93_v24 = vpack.c.bf16 %v92_v23, %v91_v22 }
  0xe1   :  { %385 = vmatmul.mubr.bf16.vlgmr.msra.gmra.mrb[0].mxu1 %v93_v24 }
 0x1b4   :  { %v199_v28 = vpop.f32.mrb[0].mxu1 }
 0x1b5   :  { %v200_v29 = vadd.f32 %v322_v27, %v199_v28  ;;  %v386_v30 = vpop.f32.mrb[1].mxu1 }
 0x1b6   :  { %v202_v31 = vpop.f32.mrb[2].mxu1 }
 0x1b7   :  { %v203_v32 = vadd.f32 %v322_v27, %v202_v31  ;;  %v387_v33 = vpop.f32.mrb[3].mxu1  ;;  %v206_v34 = vmax.f32 %v200_v29, 0.0 }
 0x1b9   :  { %v207_v35 = vmax.f32 %v203_v32, 0.0 }
 0x1bb   :  { %v208_v36 = vpack.c.bf16 %v207_v35, %v206_v34 }
 0x1bd   :  { %397 = vmatmul.mubr.msk.bf16.vlgmr.msra.gmra.mrb[4].mxu0 %vm248_vm2, %v208_v36 }
 0x290   :  { %v286_v38 = vpop.f32.mrb[4].mxu0 }
 0x291   :  { %v398_v39 = vpop.f32.mrb[5].mxu0  ;;  %v287_v41 = vadd.f32 %v331_v37, %v286_v38 }
 0x292   :  { %v289_v40 = vpop.f32.mrb[6].mxu0 }
 0x293   :  { %v290_v42 = vadd.f32 %v331_v37, %v289_v40  ;;  %v399_v43 = vpop.f32.mrb[7].mxu0 }
 0x295   :  { %v344_v44 = vpack.c.bf16 %v290_v42, %v287_v41 }
 0x297   :  { %345 = vst [vmem:[#allocation2] sm:$0xff] %v344_v44  }
 0x298   :  { %429 = shalt.err (!%p426_p4)
}
 0x299   :  { %s430_s10 = scalar_lea.hbm %s560_s7, 128 }
 0x29a   :  { %p431_p5 = scmp.ne.s32.totalorder %s560_s7, %s430_s10  ;;  %p434_p6 = scmp.lt.u32.totalorder %s430_s10, %s560_s7 }
 0x29c   :  { %p436_p7 = pnand %p434_p6, %p431_p5 }
 0x29e   :  { %439 = shalt.err (!%p436_p7)
}
 0x29f   :  { %s445_s15 = smov 64   ;;  %s446_s16 = smov 4  }
 0x2a0   :  { %314 = dma.vmem_to_hbm [thread:$0]  %s309_s9, 128, %s560_s7, [#allocation3], %s445_s15, %s445_s15, %s446_s16  }
 0x2a1   :  { %440 = dma.done.wait [#allocation3], 128  }
 0x2a2   :  { %441 = vsyncadd [#allocation3], 4294967168 }
 0x2a3   :  { %318 = vsyncpa [#allocation3], 1 }

</bundles_post_ra>
